<compile_context>
chip_gen: v7x
topology: tpu7x:2x2x1
jax: 0.10.0
libtpu: 0.0.40
codegen_flags: <defaults>
</compile_context>

<pallas_src>
import functools
import math

import jax
import jax.numpy as jnp
import numpy as np
from jax import lax
from jax.experimental import pallas as pl
from jax.experimental.pallas import tpu as pltpu

BN_EPS = 1e-5
_INV_SQRT2 = 1.0 / math.sqrt(2.0)


def _fused_cnn_kernel(x_ref, maskw_ref, dwb_ref, gamma_ref, beta_ref,
                      pw_ref, pwb_ref, o_ref, *, N, C, H, W, O):
    # x_ref    : (N*C, H*W)     input; row r = (n, c) with c = r % C, lane = h*W + w
    # maskw_ref: (9, N*C, H*W)  per-tap depthwise weight with boundary mask pre-folded in
    # dwb_ref  : (N*C, 1)       depthwise conv bias, tiled over N
    # gamma_ref: (C, 1)         BN weight
    # beta_ref : (C, 1)         BN bias
    # pw_ref   : (O, C)         1x1 conv weight
    # pwb_ref  : (O, 1)         1x1 conv bias
    # o_ref    : (N*O, H*W)     output; row r = (n, o)
    HW = H * W
    x = x_ref[...]

    # ---- depthwise 3x3 conv (padding=1): circular lane rolls, masks folded into weights ----
    acc = x * maskw_ref[4]                                  # center tap (kh=1, kw=1)
    for kh in range(3):
        for kw in range(3):
            k = kh * 3 + kw
            if k == 4:
                continue
            src_off = (kh - 1) * W + (kw - 1)               # flattened source offset
            shifted = pltpu.roll(x, shift=(-src_off) % HW, axis=1)
            acc = acc + shifted * maskw_ref[k]
    acc = acc + dwb_ref[...]

    # ---- BatchNorm2d (training mode): per-channel batch stats, biased variance ----
    # Full-width (N*C, HW) passes; centered sum-of-squares (no E[x^2]-E[x]^2 cancellation).
    inv_count = 1.0 / float(N * HW)
    row_sum = jnp.sum(acc, axis=1, keepdims=True)           # (N*C, 1) lane reduction
    ch_sum = row_sum[0:C, :]
    for n in range(1, N):                                   # fold rows sharing a channel
        ch_sum = ch_sum + row_sum[n * C:(n + 1) * C, :]
    ch_mean = ch_sum * inv_count                            # (C, 1)

    mean_full = jnp.concatenate([ch_mean] * N, axis=0)      # (N*C, 1)
    d = acc - mean_full                                     # full-width centered pass
    row_ss = jnp.sum(d * d, axis=1, keepdims=True)          # (N*C, 1)
    ch_ss = row_ss[0:C, :]
    for n in range(1, N):
        ch_ss = ch_ss + row_ss[n * C:(n + 1) * C, :]

    inv_std = lax.rsqrt(ch_ss * inv_count + BN_EPS)         # (C, 1)
    bn_scale = gamma_ref[...] * inv_std                     # (C, 1)
    bn_shift = beta_ref[...] - ch_mean * bn_scale           # (C, 1)
    scale_full = jnp.concatenate([bn_scale] * N, axis=0)    # (N*C, 1)
    shift_full = jnp.concatenate([bn_shift] * N, axis=0)    # (N*C, 1)

    # ---- normalize + exact erf GELU on the full (N*C, HW) block ----
    xn = acc * scale_full + shift_full
    g = 0.5 * xn * (1.0 + lax.erf(xn * _INV_SQRT2))

    # ---- 1x1 conv on the MXU (per image); result is already lane-dense ----
    pw = pw_ref[...]                                        # (O, C)
    pwb = pwb_ref[...]                                      # (O, 1)
    for n in range(N):
        g_n = g[n * C:(n + 1) * C, :]                       # (C, HW)
        out_n = jnp.dot(pw, g_n, preferred_element_type=jnp.float32) + pwb
        o_ref[n * O:(n + 1) * O, :] = out_n.astype(o_ref.dtype)


def cnn_layer(x_nchw, dw_w, dw_b, bn_gamma, bn_beta, pw_w, pw_b):
    """
    x_nchw  : (N, C, H, W)   float32
    dw_w    : (C, 1, 3, 3)   depthwise conv weight (PyTorch layout)
    dw_b    : (C,)
    bn_gamma: (C,)
    bn_beta : (C,)
    pw_w    : (O, C, 1, 1)   1x1 conv weight (PyTorch layout)
    pw_b    : (O,)
    returns : (N, O, H, W)
    """
    N, C, H, W = x_nchw.shape
    O = pw_w.shape[0]
    HW = H * W

    # Lane-dense view of the input: pure reshape of NCHW (no transpose, no pad).
    x2 = x_nchw.astype(jnp.float32).reshape(N * C, HW)

    # Per-tap boundary-validity masks (compile-time numpy constants), folded into the
    # depthwise weights so the in-kernel tap body is a single multiply-add.
    hh, ww = np.meshgrid(np.arange(H), np.arange(W), indexing="ij")
    masks_np = np.zeros((9, HW), np.float32)
    for kh in range(3):
        for kw in range(3):
            valid = ((hh + kh - 1 >= 0) & (hh + kh - 1 < H) &
                     (ww + kw - 1 >= 0) & (ww + kw - 1 < W))
            masks_np[kh * 3 + kw] = valid.reshape(-1).astype(np.float32)
    masks = jnp.asarray(masks_np)                                        # (9, HW)

    # Tiny parameter re-layouts (O(C), O(C*O), O(9*N*C*HW) work, done once outside the kernel).
    w9c = jnp.transpose(dw_w.reshape(C, 9)).astype(jnp.float32)          # (9, C)
    maskw = w9c[:, :, None] * masks[:, None, :]                          # (9, C, HW)
    maskw = jnp.tile(maskw, (1, N, 1))                                   # (9, N*C, HW)
    dwb = jnp.tile(dw_b.reshape(C, 1).astype(jnp.float32), (N, 1))       # (N*C, 1)
    gamma = bn_gamma.reshape(C, 1).astype(jnp.float32)
    beta = bn_beta.reshape(C, 1).astype(jnp.float32)
    pw = pw_w[:, :, 0, 0].astype(jnp.float32)                            # (O, C)
    pwb = pw_b.reshape(O, 1).astype(jnp.float32)

    kernel = functools.partial(_fused_cnn_kernel, N=N, C=C, H=H, W=W, O=O)

    out2 = pl.pallas_call(
        kernel,
        out_shape=jax.ShapeDtypeStruct((N * O, HW), jnp.float32),
        in_specs=[pl.BlockSpec(memory_space=pltpu.MemorySpace.VMEM)] * 7,
        out_specs=pl.BlockSpec(memory_space=pltpu.MemorySpace.VMEM),
        compiler_params=pltpu.CompilerParams(vmem_limit_bytes=32 * 1024 * 1024),
    )(x2, maskw, dwb, gamma, beta, pw, pwb)

    # Free reshape back to NCHW output.
    return out2.reshape(N, O, H, W)


# ----------------------------------------------------------------------------
# Pure-JAX reference (mirrors the PyTorch forward in training mode).
# ----------------------------------------------------------------------------
def reference(x_nchw, dw_w, dw_b, bn_gamma, bn_beta, pw_w, pw_b):
    C = x_nchw.shape[1]
    y = jax.lax.conv_general_dilated(
        x_nchw, dw_w, window_strides=(1, 1), padding=((1, 1), (1, 1)),
        dimension_numbers=("NCHW", "OIHW", "NCHW"), feature_group_count=C)
    y = y + dw_b[None, :, None, None]
    mean = jnp.mean(y, axis=(0, 2, 3), keepdims=True)
    var = jnp.mean((y - mean) ** 2, axis=(0, 2, 3), keepdims=True)
    yn = (y - mean) / jnp.sqrt(var + BN_EPS)
    yn = yn * bn_gamma[None, :, None, None] + bn_beta[None, :, None, None]
    g = jax.nn.gelu(yn, approximate=False)
    out = jnp.einsum("nchw,oc->nohw", g, pw_w[:, :, 0, 0]) + pw_b[None, :, None, None]
    return out


if __name__ == "__main__":
    # Small demo shapes consistent with the module: hidden_dim=4, out_dim=8.
    N, C, H, W, O = 2, 4, 16, 16, 8

    key = jax.random.PRNGKey(0)
    k1, k2, k3, k4, k5, k6, k7 = jax.random.split(key, 7)

    x = jax.random.normal(k1, (N, C, H, W), jnp.float32)

    # Deterministic synthetic parameters (PyTorch-layout shapes from __init__).
    dw_w = 0.2 * jax.random.normal(k2, (C, 1, 3, 3), jnp.float32)      # Conv2d(C,C,3,groups=C)
    dw_b = 0.1 * jax.random.normal(k3, (C,), jnp.float32)
    bn_gamma = 1.0 + 0.1 * jax.random.normal(k4, (C,), jnp.float32)    # BatchNorm2d(C)
    bn_beta = 0.1 * jax.random.normal(k5, (C,), jnp.float32)
    pw_w = 0.2 * jax.random.normal(k6, (O, C, 1, 1), jnp.float32)      # Conv2d(C,O,1)
    pw_b = 0.1 * jax.random.normal(k7, (O,), jnp.float32)

    out = cnn_layer(x, dw_w, dw_b, bn_gamma, bn_beta, pw_w, pw_b)
    out = jax.block_until_ready(out)

    ref = reference(x, dw_w, dw_b, bn_gamma, bn_beta, pw_w, pw_b)
    ref = jax.block_until_ready(ref)

    assert out.shape == (N, O, H, W), out.shape
    if not np.allclose(np.asarray(out), np.asarray(ref), atol=1e-3, rtol=1e-3):
        raise AssertionError("Pallas kernel output mismatch vs reference")

    print("KERNEL_OK")
</pallas_src>

<mosaic_0001>
module attributes {stable_mosaic.version = 11 : i64} {
  func.func @_fused_cnn_kernel(%arg0: memref<8x256xf32, #tpu.memory_space<vmem>>, %arg1: memref<9x8x256xf32, #tpu.memory_space<vmem>>, %arg2: memref<8x1xf32, #tpu.memory_space<vmem>>, %arg3: memref<4x1xf32, #tpu.memory_space<vmem>>, %arg4: memref<4x1xf32, #tpu.memory_space<vmem>>, %arg5: memref<8x4xf32, #tpu.memory_space<vmem>>, %arg6: memref<8x1xf32, #tpu.memory_space<vmem>>, %arg7: memref<16x256xf32, #tpu.memory_space<vmem>>) attributes {dimension_semantics = [], scalar_prefetch = 0 : i64, scratch_operands = 0 : i64, tpu.core_type = #tpu.core_type<tc>} {
    %c0 = arith.constant 0 : index
    %c0_0 = arith.constant 0 : index
    %0 = vector.load %arg0[%c0, %c0_0] : memref<8x256xf32, #tpu.memory_space<vmem>>, vector<8x256xf32>
    %c4 = arith.constant 4 : index
    %c0_1 = arith.constant 0 : index
    %c0_2 = arith.constant 0 : index
    %1 = vector.load %arg1[%c4, %c0_1, %c0_2] : memref<9x8x256xf32, #tpu.memory_space<vmem>>, vector<1x8x256xf32>
    %2 = vector.shape_cast %1 : vector<1x8x256xf32> to vector<8x256xf32>
    %3 = arith.mulf %0, %2 : vector<8x256xf32>
    %c17_i32 = arith.constant 17 : i32
    %4 = tpu.dynamic_rotate %0 by %c17_i32 dim 1 : vector<8x256xf32>, i32 -> vector<8x256xf32>
    %c0_3 = arith.constant 0 : index
    %c0_4 = arith.constant 0 : index
    %c0_5 = arith.constant 0 : index
    %5 = vector.load %arg1[%c0_3, %c0_4, %c0_5] : memref<9x8x256xf32, #tpu.memory_space<vmem>>, vector<1x8x256xf32>
    %6 = vector.shape_cast %5 : vector<1x8x256xf32> to vector<8x256xf32>
    %7 = arith.mulf %4, %6 : vector<8x256xf32>
    %8 = arith.addf %3, %7 : vector<8x256xf32>
    %c16_i32 = arith.constant 16 : i32
    %9 = tpu.dynamic_rotate %0 by %c16_i32 dim 1 : vector<8x256xf32>, i32 -> vector<8x256xf32>
    %c1 = arith.constant 1 : index
    %c0_6 = arith.constant 0 : index
    %c0_7 = arith.constant 0 : index
    %10 = vector.load %arg1[%c1, %c0_6, %c0_7] : memref<9x8x256xf32, #tpu.memory_space<vmem>>, vector<1x8x256xf32>
    %11 = vector.shape_cast %10 : vector<1x8x256xf32> to vector<8x256xf32>
    %12 = arith.mulf %9, %11 : vector<8x256xf32>
    %13 = arith.addf %8, %12 : vector<8x256xf32>
    %c15_i32 = arith.constant 15 : i32
    %14 = tpu.dynamic_rotate %0 by %c15_i32 dim 1 : vector<8x256xf32>, i32 -> vector<8x256xf32>
    %c2 = arith.constant 2 : index
    %c0_8 = arith.constant 0 : index
    %c0_9 = arith.constant 0 : index
    %15 = vector.load %arg1[%c2, %c0_8, %c0_9] : memref<9x8x256xf32, #tpu.memory_space<vmem>>, vector<1x8x256xf32>
    %16 = vector.shape_cast %15 : vector<1x8x256xf32> to vector<8x256xf32>
    %17 = arith.mulf %14, %16 : vector<8x256xf32>
    %18 = arith.addf %13, %17 : vector<8x256xf32>
    %c1_i32 = arith.constant 1 : i32
    %19 = tpu.dynamic_rotate %0 by %c1_i32 dim 1 : vector<8x256xf32>, i32 -> vector<8x256xf32>
    %c3 = arith.constant 3 : index
    %c0_10 = arith.constant 0 : index
    %c0_11 = arith.constant 0 : index
    %20 = vector.load %arg1[%c3, %c0_10, %c0_11] : memref<9x8x256xf32, #tpu.memory_space<vmem>>, vector<1x8x256xf32>
    %21 = vector.shape_cast %20 : vector<1x8x256xf32> to vector<8x256xf32>
    %22 = arith.mulf %19, %21 : vector<8x256xf32>
    %23 = arith.addf %18, %22 : vector<8x256xf32>
    %c255_i32 = arith.constant 255 : i32
    %24 = tpu.dynamic_rotate %0 by %c255_i32 dim 1 : vector<8x256xf32>, i32 -> vector<8x256xf32>
    %c5 = arith.constant 5 : index
    %c0_12 = arith.constant 0 : index
    %c0_13 = arith.constant 0 : index
    %25 = vector.load %arg1[%c5, %c0_12, %c0_13] : memref<9x8x256xf32, #tpu.memory_space<vmem>>, vector<1x8x256xf32>
    %26 = vector.shape_cast %25 : vector<1x8x256xf32> to vector<8x256xf32>
    %27 = arith.mulf %24, %26 : vector<8x256xf32>
    %28 = arith.addf %23, %27 : vector<8x256xf32>
    %c241_i32 = arith.constant 241 : i32
    %29 = tpu.dynamic_rotate %0 by %c241_i32 dim 1 : vector<8x256xf32>, i32 -> vector<8x256xf32>
    %c6 = arith.constant 6 : index
    %c0_14 = arith.constant 0 : index
    %c0_15 = arith.constant 0 : index
    %30 = vector.load %arg1[%c6, %c0_14, %c0_15] : memref<9x8x256xf32, #tpu.memory_space<vmem>>, vector<1x8x256xf32>
    %31 = vector.shape_cast %30 : vector<1x8x256xf32> to vector<8x256xf32>
    %32 = arith.mulf %29, %31 : vector<8x256xf32>
    %33 = arith.addf %28, %32 : vector<8x256xf32>
    %c240_i32 = arith.constant 240 : i32
    %34 = tpu.dynamic_rotate %0 by %c240_i32 dim 1 : vector<8x256xf32>, i32 -> vector<8x256xf32>
    %c7 = arith.constant 7 : index
    %c0_16 = arith.constant 0 : index
    %c0_17 = arith.constant 0 : index
    %35 = vector.load %arg1[%c7, %c0_16, %c0_17] : memref<9x8x256xf32, #tpu.memory_space<vmem>>, vector<1x8x256xf32>
    %36 = vector.shape_cast %35 : vector<1x8x256xf32> to vector<8x256xf32>
    %37 = arith.mulf %34, %36 : vector<8x256xf32>
    %38 = arith.addf %33, %37 : vector<8x256xf32>
    %c239_i32 = arith.constant 239 : i32
    %39 = tpu.dynamic_rotate %0 by %c239_i32 dim 1 : vector<8x256xf32>, i32 -> vector<8x256xf32>
    %c8 = arith.constant 8 : index
    %c0_18 = arith.constant 0 : index
    %c0_19 = arith.constant 0 : index
    %40 = vector.load %arg1[%c8, %c0_18, %c0_19] : memref<9x8x256xf32, #tpu.memory_space<vmem>>, vector<1x8x256xf32>
    %41 = vector.shape_cast %40 : vector<1x8x256xf32> to vector<8x256xf32>
    %42 = arith.mulf %39, %41 : vector<8x256xf32>
    %43 = arith.addf %38, %42 : vector<8x256xf32>
    %c0_20 = arith.constant 0 : index
    %c0_21 = arith.constant 0 : index
    %44 = vector.load %arg2[%c0_20, %c0_21] : memref<8x1xf32, #tpu.memory_space<vmem>>, vector<8x1xf32>
    %45 = vector.broadcast %44 : vector<8x1xf32> to vector<8x256xf32>
    %46 = arith.addf %43, %45 : vector<8x256xf32>
    %cst = arith.constant dense<0.000000e+00> : vector<8xf32>
    %47 = vector.multi_reduction <add>, %46, %cst [1] : vector<8x256xf32> to vector<8xf32>
    %48 = vector.shape_cast %47 : vector<8xf32> to vector<8x1xf32>
    %49 = vector.extract_strided_slice %48 {offsets = [0, 0], sizes = [4, 1], strides = [1, 1]} : vector<8x1xf32> to vector<4x1xf32>
    %50 = vector.extract_strided_slice %48 {offsets = [4, 0], sizes = [4, 1], strides = [1, 1]} : vector<8x1xf32> to vector<4x1xf32>
    %51 = arith.addf %49, %50 : vector<4x1xf32>
    %cst_22 = arith.constant 0.001953125 : f32
    %52 = vector.broadcast %cst_22 : f32 to vector<4x1xf32>
    %53 = arith.mulf %51, %52 : vector<4x1xf32>
    %54 = tpu.concatenate %53, %53 in 0 : vector<4x1xf32>, vector<4x1xf32> -> vector<8x1xf32>
    %55 = vector.broadcast %54 : vector<8x1xf32> to vector<8x256xf32>
    %56 = arith.subf %46, %55 : vector<8x256xf32>
    %57 = arith.mulf %56, %56 : vector<8x256xf32>
    %cst_23 = arith.constant dense<0.000000e+00> : vector<8xf32>
    %58 = vector.multi_reduction <add>, %57, %cst_23 [1] : vector<8x256xf32> to vector<8xf32>
    %59 = vector.shape_cast %58 : vector<8xf32> to vector<8x1xf32>
    %60 = vector.extract_strided_slice %59 {offsets = [0, 0], sizes = [4, 1], strides = [1, 1]} : vector<8x1xf32> to vector<4x1xf32>
    %61 = vector.extract_strided_slice %59 {offsets = [4, 0], sizes = [4, 1], strides = [1, 1]} : vector<8x1xf32> to vector<4x1xf32>
    %62 = arith.addf %60, %61 : vector<4x1xf32>
    %cst_24 = arith.constant 0.001953125 : f32
    %63 = vector.broadcast %cst_24 : f32 to vector<4x1xf32>
    %64 = arith.mulf %62, %63 : vector<4x1xf32>
    %cst_25 = arith.constant 9.99999974E-6 : f32
    %65 = vector.broadcast %cst_25 : f32 to vector<4x1xf32>
    %66 = arith.addf %64, %65 : vector<4x1xf32>
    %67 = math.rsqrt %66 : vector<4x1xf32>
    %c0_26 = arith.constant 0 : index
    %c0_27 = arith.constant 0 : index
    %68 = vector.load %arg3[%c0_26, %c0_27] : memref<4x1xf32, #tpu.memory_space<vmem>>, vector<4x1xf32>
    %69 = arith.mulf %68, %67 : vector<4x1xf32>
    %c0_28 = arith.constant 0 : index
    %c0_29 = arith.constant 0 : index
    %70 = vector.load %arg4[%c0_28, %c0_29] : memref<4x1xf32, #tpu.memory_space<vmem>>, vector<4x1xf32>
    %71 = arith.mulf %53, %69 : vector<4x1xf32>
    %72 = arith.subf %70, %71 : vector<4x1xf32>
    %73 = tpu.concatenate %69, %69 in 0 : vector<4x1xf32>, vector<4x1xf32> -> vector<8x1xf32>
    %74 = tpu.concatenate %72, %72 in 0 : vector<4x1xf32>, vector<4x1xf32> -> vector<8x1xf32>
    %75 = vector.broadcast %73 : vector<8x1xf32> to vector<8x256xf32>
    %76 = arith.mulf %46, %75 : vector<8x256xf32>
    %77 = vector.broadcast %74 : vector<8x1xf32> to vector<8x256xf32>
    %78 = arith.addf %76, %77 : vector<8x256xf32>
    %cst_30 = arith.constant 5.000000e-01 : f32
    %79 = vector.broadcast %cst_30 : f32 to vector<8x256xf32>
    %80 = arith.mulf %79, %78 : vector<8x256xf32>
    %cst_31 = arith.constant 0.707106769 : f32
    %81 = vector.broadcast %cst_31 : f32 to vector<8x256xf32>
    %82 = arith.mulf %78, %81 : vector<8x256xf32>
    %83 = math.erf %82 : vector<8x256xf32>
    %cst_32 = arith.constant 1.000000e+00 : f32
    %84 = vector.broadcast %cst_32 : f32 to vector<8x256xf32>
    %85 = arith.addf %84, %83 : vector<8x256xf32>
    %86 = arith.mulf %80, %85 : vector<8x256xf32>
    %c0_33 = arith.constant 0 : index
    %c0_34 = arith.constant 0 : index
    %87 = vector.load %arg5[%c0_33, %c0_34] : memref<8x4xf32, #tpu.memory_space<vmem>>, vector<8x4xf32>
    %c0_35 = arith.constant 0 : index
    %c0_36 = arith.constant 0 : index
    %88 = vector.load %arg6[%c0_35, %c0_36] : memref<8x1xf32, #tpu.memory_space<vmem>>, vector<8x1xf32>
    %89 = vector.extract_strided_slice %86 {offsets = [0, 0], sizes = [4, 256], strides = [1, 1]} : vector<8x256xf32> to vector<4x256xf32>
    %cst_37 = arith.constant dense<0.000000e+00> : vector<8x256xf32>
    %90 = tpu.matmul %87, %89, %cst_37 {dimension_numbers = #tpu.dot_dimension_numbers<[1], [0], [0], [1], [0, 0, 1, 1], [], []>} : vector<8x4xf32>, vector<4x256xf32>, vector<8x256xf32> -> vector<8x256xf32>
    %91 = vector.broadcast %88 : vector<8x1xf32> to vector<8x256xf32>
    %92 = arith.addf %90, %91 : vector<8x256xf32>
    %c0_38 = arith.constant 0 : index
    %c0_39 = arith.constant 0 : index
    %93 = vector.load %arg7[%c0_38, %c0_39] : memref<16x256xf32, #tpu.memory_space<vmem>>, vector<8x256xf32>
    tpu.vector_store %arg7[%c0_38, %c0_39], %92 {strides = array<i32>} : memref<16x256xf32, #tpu.memory_space<vmem>>, vector<8x256xf32>,
    %94 = vector.extract_strided_slice %86 {offsets = [4, 0], sizes = [4, 256], strides = [1, 1]} : vector<8x256xf32> to vector<4x256xf32>
    %cst_40 = arith.constant dense<0.000000e+00> : vector<8x256xf32>
    %95 = tpu.matmul %87, %94, %cst_40 {dimension_numbers = #tpu.dot_dimension_numbers<[1], [0], [0], [1], [0, 0, 1, 1], [], []>} : vector<8x4xf32>, vector<4x256xf32>, vector<8x256xf32> -> vector<8x256xf32>
    %96 = vector.broadcast %88 : vector<8x1xf32> to vector<8x256xf32>
    %97 = arith.addf %95, %96 : vector<8x256xf32>
    %c8_41 = arith.constant 8 : index
    %c0_42 = arith.constant 0 : index
    %98 = vector.load %arg7[%c8_41, %c0_42] : memref<16x256xf32, #tpu.memory_space<vmem>>, vector<8x256xf32>
    tpu.vector_store %arg7[%c8_41, %c0_42], %97 {strides = array<i32>} : memref<16x256xf32, #tpu.memory_space<vmem>>, vector<8x256xf32>,
    return
  }
}

</mosaic_0001>

<bundles_post_ra>
// kernel: tpu_custom_call.1
= control target key start
LH: loop header
LB: loop body
LE: loop exit
PB: predicated region body
PF: predicated region fallthrough
CT: control target
= control target key end

     0   :  { %12 = vsyncpa [#allocation3], 0  ;;  %s630_s0 = inlined_call_operand.vmem [shape: f32[8,256], index: 0, kind: input, shape index: {}]   ;;  %s631_s1 = inlined_call_operand.hbm [shape: f32[9,8,256], index: 1, kind: input, shape index: {}]   ;;  %s632_s2 = inlined_call_operand.vmem [shape: f32[8,1], index: 2, kind: input, shape index: {}]   ;;  %s633_s3 = inlined_call_operand.vmem [shape: f32[4,1], index: 3, kind: input, shape index: {}]   ;;  %s634_s4 = inlined_call_operand.vmem [shape: f32[4,1], index: 4, kind: input, shape index: {}]   ;;  %s635_s5 = inlined_call_operand.vmem [shape: f32[8,4], index: 5, kind: input, shape index: {}]   ;;  %s636_s6 = inlined_call_operand.vmem [shape: f32[8,1], index: 6, kind: input, shape index: {}]   ;;  %s637_s7 = inlined_call_operand.hbm [shape: f32[16,256], index: 7, kind: output, shape index: {}]  }
   0x1   :  { %13 = vsyncpa [#allocation4], 0  ;;  %s499_s24 = smov [#allocation2]   ;;  %s451_s28 = scalar_lea.hbm %s631_s1, 2304 }
   0x2   :  { %s21_s25 = sshll.u32 %s499_s24, 4  ;;  %p452_p0 = scmp.ne.s32.totalorder %s631_s1, %s451_s28  ;;  %s22_s25 = int_to_ptr.vmem [resolvable:$true] %s21_s25 }
   0x3   :  { %p455_p1 = scmp.lt.u32.totalorder %s451_s28, %s631_s1 }
   0x5   :  { %p457_p2 = pnand %p455_p1, %p452_p0 }
   0x7   :  { %460 = shalt.err (!%p457_p2)
}
   0x8   :  { %s461_s10 = scalar_lea.vmem %s22_s25, 2304  ;;  %p466_p4 = scmp.lt.s32.totalorder %s22_s25, %s22_s25 }
   0x9   :  { %p462_p3 = scmp.ne.s32.totalorder %s22_s25, %s461_s10  ;;  %p467_p5 = scmp.lt.s32.totalorder %s461_s10, %s461_s10 }
   0xb   :  { %p468_p6 = por %p467_p5, %p466_p4 }
   0xd   :  { %p469_p7 = pnand %p468_p6, %p462_p3 }
   0xf   :  { %472 = shalt.err (!%p469_p7)
}
  0x10   :  { %s500_s11 = smov 256   ;;  %s501_s12 = smov 16  }
  0x11   :  { %27 = dma.hbm_to_vmem [thread:$0]  %s631_s1, 2304, %s22_s25, [#allocation3], %s500_s11, %s500_s11, %s501_s12  }
  0x12   :  { %495 = dma.done.wait [#allocation3], 2304  }
  0x13   :  { %496 = vsyncadd [#allocation3], 4294964992  ;;  %v502_v0 = vmov 0   ;;  %v41_v1 = vld [vmem:[%s630_s0] sm:$0xff]  ;;  %s503_s17 = smov 17   ;;  %v42_v2 = vld [vmem:[%s630_s0 + $0x8] sm:$0xff]  ;;  %v52_v6 = vlaneseq }
  0x14   :  { %443 = vset.pattern.permute.xlu0 %v502_v0  ;;  %444 = vset.pattern.permute.xlu1 %v502_v0  ;;  %s504_s1 = smov 15   ;;  %s505_s20 = smov 1   ;;  %v161_v3 = vld [vmem:[%s632_s2] sm:$0xff]  ;;  %v45_v15 = vld [vmem:[#allocation2 + $0x48] sm:$0xff]  ;;  %v71_v27 = vld [vmem:[#allocation2 + $0x10] sm:$0xff]  ;;  %vm180_vm8 = vcmask 1043456  }
  0x15   :  { %63 = vrot.lane.b32.xlu1 %v41_v1, %s501_s12  ;;  %48 = vrot.lane.b32.xlu0 %v41_v1, %s503_s17  ;;  %s506_s21 = smov 127   ;;  %s507_s22 = smov 113   ;;  %v578_v9 = vand.u32 127, %v52_v6  ;;  %v44_v14 = vld [vmem:[#allocation2 + $0x40] sm:$0xff]  ;;  %v58_v17 = vld [vmem:[#allocation2 + $0x8] sm:$0xff]  ;;  %v47_v22 = vmul.f32 %v45_v15, %v42_v2  ;;  %v72_v28 = vld [vmem:[#allocation2 + $0x18] sm:$0xff] }
  0x16   :  { %s508_s23 = smov 112   ;;  %s509_s25 = smov 111   ;;  %v57_v16 = vld [vmem:[#allocation2] sm:$0xff]  ;;  %v46_v23 = vmul.f32 %v44_v14, %v41_v1  ;;  %v86_v35 = vld [vmem:[#allocation2 + $0x28] sm:$0xff]  ;;  %v99_v41 = vld [vmem:[#allocation2 + $0x30] sm:$0xff]  ;;  %vm245_vm9 = vcmask 31744  }
  0x17   :  { %vm54_vm0 = vcmp.lt.s32.totalorder %v578_v9, 17  ;;  %vm67_vm1 = vcmp.lt.s32.totalorder %v578_v9, 16  ;;  %vm81_vm2 = vcmp.lt.s32.totalorder %v578_v9, 15  ;;  %vm95_vm3 = vcmp.lt.s32.totalorder %v578_v9, 1  ;;  %v85_v34 = vld [vmem:[#allocation2 + $0x20] sm:$0xff]  ;;  %v100_v42 = vld [vmem:[#allocation2 + $0x38] sm:$0xff] }
  0x18   :  { %vm109_vm4 = vcmp.lt.s32.totalorder %v578_v9, 127  ;;  %vm123_vm5 = vcmp.lt.s32.totalorder %v578_v9, 113  ;;  %v113_v49 = vld [vmem:[#allocation2 + $0x50] sm:$0xff]  ;;  %v114_v50 = vld [vmem:[#allocation2 + $0x58] sm:$0xff]  ;;  %vm137_vm6 = vcmp.lt.s32.totalorder %v578_v9, 112  ;;  %v127_v57 = vld [vmem:[#allocation2 + $0x60] sm:$0xff] }
  0x19   :  { %65 = vrot.lane.b32.xlu1 %v42_v2, %s501_s12  ;;  %50 = vrot.lane.b32.xlu0 %v42_v2, %s503_s17  ;;  %v128_v58 = vld [vmem:[#allocation2 + $0x68] sm:$0xff]  ;;  %vm151_vm7 = vcmp.lt.s32.totalorder %v578_v9, 111 }
  0x1d   :  { %79 = vrot.lane.b32.xlu1 %v42_v2, %s504_s1  ;;  %77 = vrot.lane.b32.xlu0 %v41_v1, %s504_s1 }
  0x21   :  { %93 = vrot.lane.b32.xlu1 %v42_v2, %s505_s20  ;;  %91 = vrot.lane.b32.xlu0 %v41_v1, %s505_s20 }
  0x25   :  { %107 = vrot.lane.b32.xlu1 %v42_v2, %s506_s21  ;;  %105 = vrot.lane.b32.xlu0 %v41_v1, %s506_s21 }
  0x29   :  { %121 = vrot.lane.b32.xlu1 %v42_v2, %s507_s22  ;;  %119 = vrot.lane.b32.xlu0 %v41_v1, %s507_s22 }
  0x2d   :  { %135 = vrot.lane.b32.xlu1 %v42_v2, %s508_s23  ;;  %133 = vrot.lane.b32.xlu0 %v41_v1, %s508_s23 }
  0x31   :  { %147 = vrot.lane.b32.xlu1 %v41_v1, %s509_s25  ;;  %164 = vperm.xlu0 %443, %v161_v3   ;;  %v141_v1 = vld [vmem:[#allocation2 + $0x70] sm:$0xff] }
  0x35   :  { %149 = vrot.lane.b32.xlu1 %v42_v2, %s509_s25  ;;  %v142_v2 = vld [vmem:[#allocation2 + $0x78] sm:$0xff] }
  0x87   :  { %v64_v4 = vpop.permute.xlu1 %63  ;;  %v49_v5 = vpop.permute.xlu0 %48 }
  0x8b   :  { %v66_v7 = vpop.permute.xlu1 %65  ;;  %v51_v8 = vpop.permute.xlu0 %50 }
  0x8c   :  { %v55_v18 = vsel %vm54_vm0, %v49_v5, %v51_v8  ;;  %v56_v19 = vsel %vm54_vm0, %v51_v8, %v49_v5  ;;  %v68_v29 = vsel %vm67_vm1, %v64_v4, %v66_v7  ;;  %v69_v30 = vsel %vm67_vm1, %v66_v7, %v64_v4 }
  0x8d   :  { %v59_v24 = vmul.f32 %v57_v16, %v56_v19  ;;  %v60_v25 = vmul.f32 %v58_v17, %v55_v18  ;;  %v73_v38 = vmul.f32 %v71_v27, %v69_v30  ;;  %v74_v39 = vmul.f32 %v72_v28, %v68_v29 }
  0x8f   :  { %v80_v10 = vpop.permute.xlu1 %79  ;;  %v78_v11 = vpop.permute.xlu0 %77  ;;  %v61_v31 = vadd.f32 %v59_v24, %v46_v23  ;;  %v62_v32 = vadd.f32 %v60_v25, %v47_v22 }
  0x90   :  { %v82_v36 = vsel %vm81_vm2, %v78_v11, %v80_v10  ;;  %v83_v37 = vsel %vm81_vm2, %v80_v10, %v78_v11  ;;  %v155_v11 = vld [vmem:[#allocation2 + $0x80] sm:$0xff] }
  0x91   :  { %v76_v45 = vadd.f32 %v74_v39, %v62_v32  ;;  %v75_v46 = vadd.f32 %v73_v38, %v61_v31  ;;  %v87_v47 = vmul.f32 %v85_v34, %v83_v37  ;;  %v88_v48 = vmul.f32 %v86_v35, %v82_v36 }
  0x93   :  { %v94_v12 = vpop.permute.xlu1 %93  ;;  %v92_v13 = vpop.permute.xlu0 %91  ;;  %v89_v61 = vadd.f32 %v87_v47, %v75_v46  ;;  %v90_v62 = vadd.f32 %v88_v48, %v76_v45  ;;  %v201_v47 = vld [vmem:[%s633_s3] sm:$0xf] }
  0x94   :  { %v96_v43 = vsel %vm95_vm3, %v92_v13, %v94_v12  ;;  %v97_v44 = vsel %vm95_vm3, %v94_v12, %v92_v13  ;;  %v156_v12 = vld [vmem:[#allocation2 + $0x88] sm:$0xff] }
  0x95   :  { %v101_v53 = vmul.f32 %v99_v41, %v97_v44  ;;  %v102_v54 = vmul.f32 %v100_v42, %v96_v43 }
  0x97   :  { %v108_v20 = vpop.permute.xlu1 %107  ;;  %v106_v21 = vpop.permute.xlu0 %105  ;;  %v103_v5 = vadd.f32 %v101_v53, %v89_v61  ;;  %v104_v6 = vadd.f32 %v102_v54, %v90_v62 }
  0x98   :  { %v110_v51 = vsel %vm109_vm4, %v106_v21, %v108_v20  ;;  %v111_v52 = vsel %vm109_vm4, %v108_v20, %v106_v21 }
  0x99   :  { %v115_v63 = vmul.f32 %v113_v49, %v110_v51  ;;  %v116_v0 = vmul.f32 %v114_v50, %v111_v52  ;;  %v203_v50 = vld [vmem:[%s634_s4] sm:$0xf] }
  0x9b   :  { %v122_v26 = vpop.permute.xlu1 %121  ;;  %v120_v33 = vpop.permute.xlu0 %119  ;;  %v117_v15 = vadd.f32 %v115_v63, %v103_v5  ;;  %v118_v16 = vadd.f32 %v116_v0, %v104_v6 }
  0x9c   :  { %v124_v59 = vsel %vm123_vm5, %v120_v33, %v122_v26  ;;  %v125_v60 = vsel %vm123_vm5, %v122_v26, %v120_v33 }
  0x9d   :  { %v129_v7 = vmul.f32 %v127_v57, %v124_v59  ;;  %v130_v8 = vmul.f32 %v128_v58, %v125_v60  ;;  %v510_v58 = vmov 0.0  }
  0x9e   :  { %319 = vmatprep.mubr.f32.mxu0 %v510_v58  ;;  %398 = vmatprep.mubr.f32.mxu1 %v510_v58 }
  0x9f   :  { %v136_v40 = vpop.permute.xlu1 %135  ;;  %v134_v55 = vpop.permute.xlu0 %133  ;;  %v131_v19 = vadd.f32 %v129_v7, %v117_v15  ;;  %v132_v20 = vadd.f32 %v130_v8, %v118_v16 }
  0xa0   :  { %v138_v3 = vsel %vm137_vm6, %v134_v55, %v136_v40  ;;  %v139_v4 = vsel %vm137_vm6, %v136_v40, %v134_v55  ;;  %v239_v55 = vld [vmem:[%s636_s6] sm:$0xff]  ;;  %s511_s6 = smov [#allocation5]  }
  0xa1   :  { %v143_v17 = vmul.f32 %v141_v1, %v138_v3  ;;  %v144_v18 = vmul.f32 %v142_v2, %v139_v4  ;;  %s412_s8 = sshll.u32 %s511_s6, 4  ;;  %s413_s8 = int_to_ptr.vmem [resolvable:$true] %s412_s8 }
  0xa2   :  { %p478_p9 = scmp.lt.s32.totalorder %s413_s8, %s413_s8 }
  0xa3   :  { %v148_v56 = vpop.permute.xlu1 %147  ;;  %v145_v23 = vadd.f32 %v143_v17, %v131_v19  ;;  %v146_v24 = vadd.f32 %v144_v18, %v132_v20 }
  0xa7   :  { %v150_v10 = vpop.permute.xlu1 %149 }
  0xa8   :  { %v152_v13 = vsel %vm151_vm7, %v148_v56, %v150_v10  ;;  %v153_v14 = vsel %vm151_vm7, %v150_v10, %v148_v56 }
  0xa9   :  { %v157_v21 = vmul.f32 %v155_v11, %v152_v13  ;;  %v158_v22 = vmul.f32 %v156_v12, %v153_v14  ;;  %v238_v12 = vld [vmem:[%s635_s5] sm:$0xff]  ;;  %s473_s5 = scalar_lea.vmem %s413_s8, 512 }
  0xaa   :  { %p474_p8 = scmp.ne.s32.totalorder %s413_s8, %s473_s5  ;;  %p479_p10 = scmp.lt.s32.totalorder %s473_s5, %s473_s5 }
  0xab   :  { %v160_v25 = vadd.f32 %v158_v22, %v146_v24  ;;  %v159_v26 = vadd.f32 %v157_v21, %v145_v23 }
  0xac   :  { %p480_p11 = por %p479_p10, %p478_p9 }
  0xae   :  { %p481_p12 = pnand %p480_p11, %p474_p8 }
  0xb0   :  { %v165_v27 = vpop.permute.xlu0 %164 }
  0xb1   :  { %v167_v28 = vadd.f32 %v165_v27, %v159_v26  ;;  %v168_v29 = vadd.f32 %v165_v27, %v160_v25 }
  0xb3   :  { %v169_v30 = vadd.f32 %v168_v29, %v167_v28 }
  0xb5   :  { %170 = vadd.xlane.f32.xlu0 %v169_v30 }
 0x142   :  { %v171_v31 = vpop.xlane.xlu0 %170 }
 0x143   :  { %v173_v9 = vrot.slane %v171_v31, 4 }
 0x145   :  { %v175_v32 = vadd.f32 %v173_v9, %v171_v31 }
 0x147   :  { %v176_v33 = vmul.f32 0.001953125, %v175_v32 }
 0x149   :  { %v178_v34 = vrot.slane %v176_v33, 4 }
 0x14b   :  { %v181_v35 = vsel %vm180_vm8, %v176_v33, %v178_v34 }
 0x14c   :  { %184 = vperm.xlu1 %444, %v181_v35  }
 0x1cb   :  { %v185_v36 = vpop.permute.xlu1 %184 }
 0x1cc   :  { %v187_v37 = vsub.f32 %v167_v28, %v185_v36  ;;  %v188_v38 = vsub.f32 %v168_v29, %v185_v36 }
 0x1ce   :  { %v189_v39 = vmul.f32 %v187_v37, %v187_v37  ;;  %v190_v40 = vmul.f32 %v188_v38, %v188_v38 }
 0x1d0   :  { %v191_v41 = vadd.f32 %v190_v40, %v189_v39 }
 0x1d2   :  { %192 = vadd.xlane.f32.xlu1 %v191_v41 }
 0x25f   :  { %v193_v42 = vpop.xlane.xlu1 %192 }
 0x260   :  { %v195_v43 = vrot.slane %v193_v42, 4 }
 0x262   :  { %v197_v44 = vadd.f32 %v195_v43, %v193_v42 }
 0x264   :  { %v198_v45 = vmul.f32 0.001953125, %v197_v44 }
 0x266   :  { %v199_v46 = vadd.f32 1e-05, %v198_v45 }
 0x268   :  { %445 = vrsqrt.f32 %v199_v46 }
 0x272   :  { %v446_v48 = vpop.eup %445 }
 0x273   :  { %v202_v49 = vmul.f32 %v446_v48, %v201_v47 }
 0x275   :  { %v207_v51 = vrot.slane %v202_v49, 4  ;;  %v204_v52 = vmul.f32 %v202_v49, %v176_v33 }
 0x277   :  { %v209_v53 = vsel %vm180_vm8, %v202_v49, %v207_v51  ;;  %v205_v54 = vsub.f32 %v203_v50, %v204_v52 }
 0x278   :  { %216 = vperm.xlu0 %443, %v209_v53  }
 0x279   :  { %v211_v56 = vrot.slane %v205_v54, 4 }
 0x27b   :  { %v213_v57 = vsel %vm180_vm8, %v205_v54, %v211_v56 }
 0x27c   :  { %242 = vperm.xlu0 %443, %v239_v55   ;;  %223 = vperm.xlu1 %444, %v213_v57  }
 0x2f7   :  { %v217_v59 = vpop.permute.xlu0 %216 }
 0x2f8   :  { %v219_v60 = vmul.f32 %v217_v59, %v167_v28  ;;  %v220_v61 = vmul.f32 %v217_v59, %v168_v29 }
 0x2fb   :  { %v224_v62 = vpop.permute.xlu1 %223  ;;  %v243_v15 = vpop.permute.xlu0 %242 }
 0x2fc   :  { %v226_v63 = vadd.f32 %v224_v62, %v219_v60  ;;  %v227_v0 = vadd.f32 %v224_v62, %v220_v61 }
 0x2fe   :  { %v230_v1 = vmul.f32 0.70710677, %v226_v63  ;;  %v231_v2 = vmul.f32 0.70710677, %v227_v0  ;;  %v228_v5 = vmul.f32 0.5, %v226_v63  ;;  %v229_v7 = vmul.f32 0.5, %v227_v0 }
 0x300   :  { %447 = verf.f32 %v230_v1 }
 0x301   :  { %449 = verf.f32 %v231_v2 }
 0x30a   :  { %v448_v3 = vpop.eup %447 }
 0x30b   :  { %v450_v4 = vpop.eup %449  ;;  %v234_v6 = vadd.f32 1.0, %v448_v3 }
 0x30c   :  { %v235_v8 = vadd.f32 1.0, %v450_v4 }
 0x30d   :  { %v236_v10 = vmul.f32 %v234_v6, %v228_v5 }
 0x30e   :  { %v237_v11 = vmul.f32 %v235_v8, %v229_v7 }
 0x30f   :  { %v328_v13 = vrot.slane %v236_v10, 4 }
 0x310   :  { %424 = vmatprep.subr.msk.mxu0 %vm180_vm8, %v237_v11  ;;  %v329_v14 = vrot.slane %v237_v11, 4 }
 0x311   :  { %425 = vmatpush1.msk.msra.mxu0 %vm180_vm8, %v236_v10 }
 0x312   :  { %426 = vmatmul.mubr.msk.f32.vlgmr.msra.gmra.mrb[0].mxu0 %vm245_vm9, %v238_v12  ;;  %427 = vmatprep.subr.msk.mxu1 %vm180_vm8, %v329_v14 }
 0x313   :  { %428 = vmatpush1.msk.msra.mxu1 %vm180_vm8, %v328_v13 }
 0x314   :  { %429 = vmatmul.mubr.msk.f32.vlgmr.msra.gmra.mrb[0].mxu1 %vm245_vm9, %v238_v12 }
 0x3e5   :  { %v321_v16 = vpop.f32.mrb[0].mxu0 }
 0x3e6   :  { %v322_v17 = vadd.f32 %v321_v16, %v243_v15  ;;  %v323_v18 = vpop.f32.mrb[1].mxu0 }
 0x3e7   :  { %v324_v19 = vadd.f32 %v323_v18, %v243_v15  ;;  %v400_v20 = vpop.f32.mrb[0].mxu1 }
 0x3e8   :  { %326 = vst [vmem:[#allocation5] sm:$0xff] %v322_v17  ;;  %v401_v21 = vadd.f32 %v400_v20, %v243_v15  ;;  %v402_v22 = vpop.f32.mrb[1].mxu1 }
 0x3e9   :  { %327 = vst [vmem:[#allocation5 + $0x8] sm:$0xff] %v324_v19  ;;  %v403_v23 = vadd.f32 %v402_v22, %v243_v15 }
 0x3ea   :  { %405 = vst [vmem:[#allocation5 + $0x10] sm:$0xff] %v401_v21 }
 0x3eb   :  { %406 = vst [vmem:[#allocation5 + $0x18] sm:$0xff] %v403_v23 }
 0x3ec   :  { %484 = shalt.err (!%p481_p12)
}
 0x3ed   :  { %s485_s13 = scalar_lea.hbm %s637_s7, 512 }
 0x3ee   :  { %p486_p13 = scmp.ne.s32.totalorder %s637_s7, %s485_s13  ;;  %p489_p0 = scmp.lt.u32.totalorder %s485_s13, %s637_s7 }
 0x3f0   :  { %p491_p1 = pnand %p489_p0, %p486_p13 }
 0x3f2   :  { %494 = shalt.err (!%p491_p1)
}
 0x3f3   :  { %418 = dma.vmem_to_hbm [thread:$0]  %s413_s8, 512, %s637_s7, [#allocation4], %s500_s11, %s500_s11, %s501_s12  }
 0x3f4   :  { %497 = dma.done.wait [#allocation4], 512  }
 0x3f5   :  { %498 = vsyncadd [#allocation4], 4294966784 }
 0x3f6   :  { %422 = vsyncpa [#allocation3], 1 }
 0x3f7   :  { %423 = vsyncpa [#allocation4], 1 }

</bundles_post_ra>
